<compile_context>
chip_gen: v7x
topology: tpu7x:2x2x1
jax: 0.10.0
libtpu: 0.0.40
codegen_flags: <defaults>
</compile_context>

<pallas_src>
import functools

import jax
import jax.numpy as jnp
from jax.experimental import pallas as pl
from jax.experimental.pallas import tpu as pltpu

_NOUT = 128  # lane-dense padded width of the final layer (q1=col 0, q2=col 1)


def _round_up(x, m):
    return (x + m - 1) // m * m


def _pack_rows(mats, ncols):
    """Stack matrices along rows; each segment starts at a multiple of 8 rows
    (sublane-aligned).  Returns (slab, row_offsets)."""
    offsets, rows = [], 0
    for m in mats:
        rows = _round_up(rows, 8)
        offsets.append(rows)
        rows += m.shape[0]
    total = _round_up(rows, 8)
    slab = jnp.zeros((total, ncols), jnp.float32)
    for off, m in zip(offsets, mats):
        slab = slab.at[off:off + m.shape[0], :].set(m)
    return slab, tuple(offsets)


def _pack_cols(vecs):
    """Pack (1, n) bias rows into one (1, total) row; each segment starts at a
    multiple of 128 lanes (lane-aligned).  Returns (slab, col_offsets)."""
    offsets, cols = [], 0
    for v in vecs:
        cols = _round_up(cols, 128)
        offsets.append(cols)
        cols += v.shape[-1]
    total = _round_up(cols, 128)
    slab = jnp.zeros((1, total), jnp.float32)
    for off, v in zip(offsets, vecs):
        slab = slab.at[:, off:off + v.shape[-1]].set(v.reshape(1, -1))
    return slab, tuple(offsets)


def double_critic_kernel(state_ref, action_ref, ws_ref, wq_ref, wqc_ref, b_ref,
                         q_ref, *, dims, ws_off, wq_off, b_off):
    S, A, H = dims
    o_s1, o_s2 = ws_off                  # rows of w_s1 (S,H), w_s2 (H,H)
    o_qh, o_qa, o_qb = wq_off            # rows of w_qa_h (H,2H), w_qa_a (A,2H), w_qb (2H,2H)
    c_s1, c_s2, c_qa, c_qb, c_qc = b_off

    s = state_ref[...]                   # (TB, S)
    a = action_ref[...]                  # (TB, A)

    b_s1 = b_ref[:, c_s1:c_s1 + H]
    b_s2 = b_ref[:, c_s2:c_s2 + H]
    b_qa = b_ref[:, c_qa:c_qa + 2 * H]
    b_qb = b_ref[:, c_qb:c_qb + 2 * H]
    b_qc = b_ref[:, c_qc:c_qc + _NOUT]

    # state_mlp: Linear -> ReLU -> Linear
    h = jnp.dot(s, ws_ref[o_s1:o_s1 + S, :],
                preferred_element_type=jnp.float32) + b_s1
    h = jnp.maximum(h, 0.0)
    h = jnp.dot(h, ws_ref[o_s2:o_s2 + H, :],
                preferred_element_type=jnp.float32) + b_s2

    # fused twin Q-nets; concat(h, a) @ W == h @ W[:H] + a @ W[H:]
    z = (jnp.dot(h, wq_ref[o_qh:o_qh + H, :],
                 preferred_element_type=jnp.float32)
         + jnp.dot(a, wq_ref[o_qa:o_qa + A, :],
                   preferred_element_type=jnp.float32)
         + b_qa)
    z = jnp.maximum(z, 0.0)
    z = jnp.dot(z, wq_ref[o_qb:o_qb + 2 * H, :],
                preferred_element_type=jnp.float32) + b_qb
    z = jnp.maximum(z, 0.0)
    # block-diagonal final layer, padded to 128 lanes: col 0 is q1, col 1 is q2
    q_ref[...] = jnp.dot(z, wqc_ref[...],
                         preferred_element_type=jnp.float32) + b_qc


def double_critic_forward(state, action, packed, *, tile_b=None):
    S, A, H = packed["dims"]
    B = state.shape[0]

    # batch tile: multiple of 8 sublanes, capped so VMEM stays comfortable
    if tile_b is None:
        tile_b = 256
    TB = _round_up(min(tile_b, _round_up(B, 8)), 8)
    Bp = _round_up(B, TB)
    if Bp != B:
        state = jnp.pad(state, ((0, Bp - B), (0, 0)))
        action = jnp.pad(action, ((0, Bp - B), (0, 0)))
    nb = Bp // TB

    ws_slab, wq_slab, wqc, b_slab = (packed["ws_slab"], packed["wq_slab"],
                                     packed["wqc"], packed["b_slab"])

    kernel = functools.partial(
        double_critic_kernel, dims=(S, A, H),
        ws_off=packed["ws_off"], wq_off=packed["wq_off"], b_off=packed["b_off"])

    def batch_spec(last):
        return pl.BlockSpec((TB, last), lambda i: (i, 0))

    def resident_spec(arr):
        return pl.BlockSpec(arr.shape, lambda i: (0, 0))

    # advisory cost estimate (per-layer 2*M*K*N flops)
    flops = 2 * Bp * (S * H + H * H + H * 2 * H + A * 2 * H
                      + 2 * H * 2 * H + 2 * H * _NOUT)
    bytes_accessed = 4 * (Bp * (S + A + _NOUT) + int(ws_slab.size)
                          + int(wq_slab.size) + int(wqc.size) + int(b_slab.size))
    cost = pl.CostEstimate(flops=int(flops), transcendentals=0,
                           bytes_accessed=int(bytes_accessed))

    # explicit VMEM budget: resident params + double-buffered tile I/O +
    # intermediates, with margin; capped well below v7x's 64 MiB physical VMEM.
    param_bytes = 4 * (int(ws_slab.size) + int(wq_slab.size)
                       + int(wqc.size) + int(b_slab.size))
    tile_bytes = 4 * TB * (S + A + _NOUT + H + 2 * H)
    vmem_limit = int(min(max(4 * (param_bytes + 4 * tile_bytes), 16 << 20),
                         48 << 20))

    q = pl.pallas_call(
        kernel,
        out_shape=jax.ShapeDtypeStruct((Bp, _NOUT), jnp.float32),
        grid_spec=pltpu.PrefetchScalarGridSpec(
            num_scalar_prefetch=0,
            grid=(nb,),
            in_specs=[
                batch_spec(S),            # state tile
                batch_spec(A),            # action tile
                resident_spec(ws_slab),   # state-MLP weights (resident)
                resident_spec(wq_slab),   # fused twin-Q weights (resident)
                resident_spec(wqc),       # fused final weight, 128-lane padded
                resident_spec(b_slab),    # all biases (resident)
            ],
            out_specs=batch_spec(_NOUT),
        ),
        compiler_params=pltpu.CompilerParams(
            dimension_semantics=("parallel",),
            vmem_limit_bytes=vmem_limit,
        ),
        cost_estimate=cost,
    )(state, action, ws_slab, wq_slab, wqc, b_slab)

    q1 = q[:B, 0:1]
    q2 = q[:B, 1:2]
    return q1, q2


def init_params(key, state_dim, action_dim, hidden_dim):
    """PyTorch-style uniform(-1/sqrt(fan_in), +) init; weights stored (in, out)."""
    def linear(k, fan_in, fan_out):
        kw, kb = jax.random.split(k)
        bound = 1.0 / jnp.sqrt(fan_in)
        w = jax.random.uniform(kw, (fan_in, fan_out), jnp.float32, -bound, bound)
        b = jax.random.uniform(kb, (1, fan_out), jnp.float32, -bound, bound)
        return w, b

    keys = jax.random.split(key, 8)
    p = {}
    p["w_s1"], p["b_s1"] = linear(keys[0], state_dim, hidden_dim)
    p["w_s2"], p["b_s2"] = linear(keys[1], hidden_dim, hidden_dim)
    p["w_q1a"], p["b_q1a"] = linear(keys[2], hidden_dim + action_dim, hidden_dim)
    p["w_q1b"], p["b_q1b"] = linear(keys[3], hidden_dim, hidden_dim)
    p["w_q1c"], p["b_q1c"] = linear(keys[4], hidden_dim, 1)
    p["w_q2a"], p["b_q2a"] = linear(keys[5], hidden_dim + action_dim, hidden_dim)
    p["w_q2b"], p["b_q2b"] = linear(keys[6], hidden_dim, hidden_dim)
    p["w_q2c"], p["b_q2c"] = linear(keys[7], hidden_dim, 1)
    return p


def pack_params(p, state_dim, action_dim, hidden_dim):
    """Fuse the twin Q-nets and pack everything into 4 slabs."""
    S, A, H = state_dim, action_dim, hidden_dim

    # fused Q first layer: columns = [q1 | q2]
    w_qa_h = jnp.concatenate([p["w_q1a"][:H], p["w_q2a"][:H]], axis=1)   # (H, 2H)
    w_qa_a = jnp.concatenate([p["w_q1a"][H:], p["w_q2a"][H:]], axis=1)   # (A, 2H)
    b_qa = jnp.concatenate([p["b_q1a"], p["b_q2a"]], axis=1)             # (1, 2H)

    # fused Q second layer: block-diagonal (2H, 2H)
    zhh = jnp.zeros((H, H), jnp.float32)
    w_qb = jnp.concatenate(
        [jnp.concatenate([p["w_q1b"], zhh], axis=1),
         jnp.concatenate([zhh, p["w_q2b"]], axis=1)], axis=0)            # (2H, 2H)
    b_qb = jnp.concatenate([p["b_q1b"], p["b_q2b"]], axis=1)             # (1, 2H)

    # fused final layer: block-diagonal, lane-padded to (2H, 128)
    #   col 0 <- w_q1c, col 1 <- w_q2c, cols 2..127 zero
    w_qc = jnp.zeros((2 * H, _NOUT), jnp.float32)
    w_qc = w_qc.at[:H, 0:1].set(p["w_q1c"])
    w_qc = w_qc.at[H:, 1:2].set(p["w_q2c"])
    b_qc = jnp.zeros((1, _NOUT), jnp.float32)
    b_qc = b_qc.at[:, 0:1].set(p["b_q1c"])
    b_qc = b_qc.at[:, 1:2].set(p["b_q2c"])

    ws_slab, ws_off = _pack_rows([p["w_s1"], p["w_s2"]], H)
    wq_slab, wq_off = _pack_rows([w_qa_h, w_qa_a, w_qb], 2 * H)
    b_slab, b_off = _pack_cols([p["b_s1"], p["b_s2"], b_qa, b_qb, b_qc])

    return dict(ws_slab=ws_slab, ws_off=ws_off,
                wq_slab=wq_slab, wq_off=wq_off,
                wqc=w_qc, b_slab=b_slab, b_off=b_off,
                dims=(S, A, H))


def reference_forward(state, action, p):
    h = jnp.maximum(state @ p["w_s1"] + p["b_s1"], 0.0)
    h = h @ p["w_s2"] + p["b_s2"]
    x = jnp.concatenate([h, action], axis=-1)

    def qnet(x, wa, ba, wb, bb, wc, bc):
        z = jnp.maximum(x @ wa + ba, 0.0)
        z = jnp.maximum(z @ wb + bb, 0.0)
        return z @ wc + bc

    q1 = qnet(x, p["w_q1a"], p["b_q1a"], p["w_q1b"], p["b_q1b"],
              p["w_q1c"], p["b_q1c"])
    q2 = qnet(x, p["w_q2a"], p["b_q2a"], p["w_q2b"], p["b_q2b"],
              p["w_q2c"], p["b_q2c"])
    return q1, q2


if __name__ == "__main__":
    # small shapes; B deliberately not a multiple of the tile to exercise padding
    B, STATE_DIM, ACTION_DIM, HIDDEN = 50, 16, 8, 32

    key = jax.random.PRNGKey(0)
    k_state, k_action, k_params = jax.random.split(key, 3)

    state = jax.random.normal(k_state, (B, STATE_DIM), jnp.float32)
    action = jax.random.normal(k_action, (B, ACTION_DIM), jnp.float32)
    params = init_params(k_params, STATE_DIM, ACTION_DIM, HIDDEN)
    packed = pack_params(params, STATE_DIM, ACTION_DIM, HIDDEN)

    q1, q2 = double_critic_forward(state, action, packed, tile_b=32)
    jax.block_until_ready((q1, q2))

    q1_ref, q2_ref = reference_forward(state, action, params)
    assert q1.shape == (B, 1) and q2.shape == (B, 1)
    assert jnp.allclose(q1, q1_ref, atol=1e-4, rtol=1e-4)
    assert jnp.allclose(q2, q2_ref, atol=1e-4, rtol=1e-4)

    # q_min equivalent (done outside the kernel): jnp.minimum(q1, q2)
    _ = jnp.minimum(q1, q2)

    print("KERNEL_OK")
</pallas_src>

<mosaic_0001>
module attributes {stable_mosaic.version = 11 : i64} {
  func.func @double_critic_kernel(%arg0: i32, %arg1: memref<32x16xf32, #tpu.memory_space<vmem>>, %arg2: memref<32x8xf32, #tpu.memory_space<vmem>>, %arg3: memref<48x32xf32, #tpu.memory_space<vmem>>, %arg4: memref<104x64xf32, #tpu.memory_space<vmem>>, %arg5: memref<64x128xf32, #tpu.memory_space<vmem>>, %arg6: memref<1x640xf32, #tpu.memory_space<vmem>>, %arg7: memref<32x128xf32, #tpu.memory_space<vmem>>) attributes {dimension_semantics = [#tpu.dimension_semantics<parallel>], iteration_bounds = array<i64: 2>, scalar_prefetch = 0 : i64, scratch_operands = 0 : i64, tpu.core_type = #tpu.core_type<tc>, window_params = [{transform_indices = @transform_0, window_bounds = array<i64: 32, 16>}, {transform_indices = @transform_1, window_bounds = array<i64: 32, 8>}, {pipeline_mode = #tpu.pipeline_mode<synchronous>, transform_indices = @transform_2, window_bounds = array<i64: 48, 32>}, {pipeline_mode = #tpu.pipeline_mode<synchronous>, transform_indices = @transform_3, window_bounds = array<i64: 104, 64>}, {pipeline_mode = #tpu.pipeline_mode<synchronous>, transform_indices = @transform_4, window_bounds = array<i64: 64, 128>}, {pipeline_mode = #tpu.pipeline_mode<synchronous>, transform_indices = @transform_5, window_bounds = array<i64: 1, 640>}, {transform_indices = @transform_6, window_bounds = array<i64: 32, 128>}]} {
    %c0 = arith.constant 0 : index
    %c0_0 = arith.constant 0 : index
    %0 = vector.load %arg1[%c0, %c0_0] : memref<32x16xf32, #tpu.memory_space<vmem>>, vector<32x16xf32>
    %c0_1 = arith.constant 0 : index
    %c0_2 = arith.constant 0 : index
    %1 = vector.load %arg2[%c0_1, %c0_2] : memref<32x8xf32, #tpu.memory_space<vmem>>, vector<32x8xf32>
    %c0_3 = arith.constant 0 : index
    %c0_4 = arith.constant 0 : index
    %2 = vector.load %arg6[%c0_3, %c0_4] : memref<1x640xf32, #tpu.memory_space<vmem>>, vector<1x32xf32>
    %c0_5 = arith.constant 0 : index
    %c128 = arith.constant 128 : index
    %3 = vector.load %arg6[%c0_5, %c128] : memref<1x640xf32, #tpu.memory_space<vmem>>, vector<1x32xf32>
    %c0_6 = arith.constant 0 : index
    %c256 = arith.constant 256 : index
    %4 = vector.load %arg6[%c0_6, %c256] : memref<1x640xf32, #tpu.memory_space<vmem>>, vector<1x64xf32>
    %c0_7 = arith.constant 0 : index
    %c384 = arith.constant 384 : index
    %5 = vector.load %arg6[%c0_7, %c384] : memref<1x640xf32, #tpu.memory_space<vmem>>, vector<1x64xf32>
    %c0_8 = arith.constant 0 : index
    %c512 = arith.constant 512 : index
    %6 = vector.load %arg6[%c0_8, %c512] : memref<1x640xf32, #tpu.memory_space<vmem>>, vector<1x128xf32>
    %c0_9 = arith.constant 0 : index
    %c0_10 = arith.constant 0 : index
    %7 = vector.load %arg3[%c0_9, %c0_10] : memref<48x32xf32, #tpu.memory_space<vmem>>, vector<16x32xf32>
    %cst = arith.constant dense<0.000000e+00> : vector<32x32xf32>
    %8 = tpu.matmul %0, %7, %cst {dimension_numbers = #tpu.dot_dimension_numbers<[1], [0], [0], [1], [0, 0, 1, 1], [], []>} : vector<32x16xf32>, vector<16x32xf32>, vector<32x32xf32> -> vector<32x32xf32>
    %9 = vector.broadcast %2 : vector<1x32xf32> to vector<32x32xf32>
    %10 = arith.addf %8, %9 : vector<32x32xf32>
    %cst_11 = arith.constant 0.000000e+00 : f32
    %11 = vector.broadcast %cst_11 : f32 to vector<32x32xf32>
    %12 = arith.maximumf %10, %11 : vector<32x32xf32>
    %c16 = arith.constant 16 : index
    %c0_12 = arith.constant 0 : index
    %13 = vector.load %arg3[%c16, %c0_12] : memref<48x32xf32, #tpu.memory_space<vmem>>, vector<32x32xf32>
    %cst_13 = arith.constant dense<0.000000e+00> : vector<32x32xf32>
    %14 = tpu.matmul %12, %13, %cst_13 {dimension_numbers = #tpu.dot_dimension_numbers<[1], [0], [0], [1], [0, 0, 1, 1], [], []>} : vector<32x32xf32>, vector<32x32xf32>, vector<32x32xf32> -> vector<32x32xf32>
    %15 = vector.broadcast %3 : vector<1x32xf32> to vector<32x32xf32>
    %16 = arith.addf %14, %15 : vector<32x32xf32>
    %c0_14 = arith.constant 0 : index
    %c0_15 = arith.constant 0 : index
    %17 = vector.load %arg4[%c0_14, %c0_15] : memref<104x64xf32, #tpu.memory_space<vmem>>, vector<32x64xf32>
    %cst_16 = arith.constant dense<0.000000e+00> : vector<32x64xf32>
    %18 = tpu.matmul %16, %17, %cst_16 {dimension_numbers = #tpu.dot_dimension_numbers<[1], [0], [0], [1], [0, 0, 1, 1], [], []>} : vector<32x32xf32>, vector<32x64xf32>, vector<32x64xf32> -> vector<32x64xf32>
    %c32 = arith.constant 32 : index
    %c0_17 = arith.constant 0 : index
    %19 = vector.load %arg4[%c32, %c0_17] : memref<104x64xf32, #tpu.memory_space<vmem>>, vector<8x64xf32>
    %cst_18 = arith.constant dense<0.000000e+00> : vector<32x64xf32>
    %20 = tpu.matmul %1, %19, %cst_18 {dimension_numbers = #tpu.dot_dimension_numbers<[1], [0], [0], [1], [0, 0, 1, 1], [], []>} : vector<32x8xf32>, vector<8x64xf32>, vector<32x64xf32> -> vector<32x64xf32>
    %21 = arith.addf %18, %20 : vector<32x64xf32>
    %22 = vector.broadcast %4 : vector<1x64xf32> to vector<32x64xf32>
    %23 = arith.addf %21, %22 : vector<32x64xf32>
    %cst_19 = arith.constant 0.000000e+00 : f32
    %24 = vector.broadcast %cst_19 : f32 to vector<32x64xf32>
    %25 = arith.maximumf %23, %24 : vector<32x64xf32>
    %c40 = arith.constant 40 : index
    %c0_20 = arith.constant 0 : index
    %26 = vector.load %arg4[%c40, %c0_20] : memref<104x64xf32, #tpu.memory_space<vmem>>, vector<64x64xf32>
    %cst_21 = arith.constant dense<0.000000e+00> : vector<32x64xf32>
    %27 = tpu.matmul %25, %26, %cst_21 {dimension_numbers = #tpu.dot_dimension_numbers<[1], [0], [0], [1], [0, 0, 1, 1], [], []>} : vector<32x64xf32>, vector<64x64xf32>, vector<32x64xf32> -> vector<32x64xf32>
    %28 = vector.broadcast %5 : vector<1x64xf32> to vector<32x64xf32>
    %29 = arith.addf %27, %28 : vector<32x64xf32>
    %cst_22 = arith.constant 0.000000e+00 : f32
    %30 = vector.broadcast %cst_22 : f32 to vector<32x64xf32>
    %31 = arith.maximumf %29, %30 : vector<32x64xf32>
    %c0_23 = arith.constant 0 : index
    %c0_24 = arith.constant 0 : index
    %32 = vector.load %arg5[%c0_23, %c0_24] : memref<64x128xf32, #tpu.memory_space<vmem>>, vector<64x128xf32>
    %cst_25 = arith.constant dense<0.000000e+00> : vector<32x128xf32>
    %33 = tpu.matmul %31, %32, %cst_25 {dimension_numbers = #tpu.dot_dimension_numbers<[1], [0], [0], [1], [0, 0, 1, 1], [], []>} : vector<32x64xf32>, vector<64x128xf32>, vector<32x128xf32> -> vector<32x128xf32>
    %34 = vector.broadcast %6 : vector<1x128xf32> to vector<32x128xf32>
    %35 = arith.addf %33, %34 : vector<32x128xf32>
    %c0_26 = arith.constant 0 : index
    %c0_27 = arith.constant 0 : index
    %36 = vector.load %arg7[%c0_26, %c0_27] : memref<32x128xf32, #tpu.memory_space<vmem>>, vector<32x128xf32>
    tpu.vector_store %arg7[%c0_26, %c0_27], %35 {strides = array<i32>} : memref<32x128xf32, #tpu.memory_space<vmem>>, vector<32x128xf32>,
    return
  }
  func.func @transform_0(%arg0: i32) -> (i32, i32) {
    %c0_i32 = arith.constant 0 : i32
    %c0_i32_0 = arith.constant 0 : i32
    return %arg0, %c0_i32 : i32, i32
  }
  func.func @transform_1(%arg0: i32) -> (i32, i32) {
    %c0_i32 = arith.constant 0 : i32
    %c0_i32_0 = arith.constant 0 : i32
    return %arg0, %c0_i32 : i32, i32
  }
  func.func @transform_2(%arg0: i32) -> (i32, i32) {
    %c0_i32 = arith.constant 0 : i32
    %c0_i32_0 = arith.constant 0 : i32
    %c0_i32_1 = arith.constant 0 : i32
    return %c0_i32, %c0_i32_0 : i32, i32
  }
  func.func @transform_3(%arg0: i32) -> (i32, i32) {
    %c0_i32 = arith.constant 0 : i32
    %c0_i32_0 = arith.constant 0 : i32
    %c0_i32_1 = arith.constant 0 : i32
    return %c0_i32, %c0_i32_0 : i32, i32
  }
  func.func @transform_4(%arg0: i32) -> (i32, i32) {
    %c0_i32 = arith.constant 0 : i32
    %c0_i32_0 = arith.constant 0 : i32
    %c0_i32_1 = arith.constant 0 : i32
    return %c0_i32, %c0_i32_0 : i32, i32
  }
  func.func @transform_5(%arg0: i32) -> (i32, i32) {
    %c0_i32 = arith.constant 0 : i32
    %c0_i32_0 = arith.constant 0 : i32
    %c0_i32_1 = arith.constant 0 : i32
    return %c0_i32, %c0_i32_0 : i32, i32
  }
  func.func @transform_6(%arg0: i32) -> (i32, i32) {
    %c0_i32 = arith.constant 0 : i32
    %c0_i32_0 = arith.constant 0 : i32
    return %arg0, %c0_i32 : i32, i32
  }
}

</mosaic_0001>

<bundles_post_ra>
// kernel: tpu_custom_call.1
= control target key start
LH: loop header
LB: loop body
LE: loop exit
PB: predicated region body
PF: predicated region fallthrough
CT: control target
= control target key end

     0   :  { %11 = vsyncpa [#allocation3], 0  ;;  %s1650_s0 = inlined_call_operand.vmem [shape: f32[64,16], index: 0, kind: input, shape index: {}]   ;;  %s1651_s1 = inlined_call_operand.vmem [shape: f32[64,8], index: 1, kind: input, shape index: {}]   ;;  %s1652_s2 = inlined_call_operand.vmem [shape: f32[48,32], index: 2, kind: input, shape index: {}]   ;;  %s1653_s3 = inlined_call_operand.vmem [shape: f32[104,64], index: 3, kind: input, shape index: {}]   ;;  %s1654_s4 = inlined_call_operand.vmem [shape: f32[64,128], index: 4, kind: input, shape index: {}]   ;;  %s1655_s5 = inlined_call_operand.vmem [shape: f32[1,640], index: 5, kind: input, shape index: {}]   ;;  %s1656_s6 = inlined_call_operand.hbm [shape: f32[64,128], index: 6, kind: output, shape index: {}]  }
   0x1   :  { %13 = vsyncpa [#allocation3 + $0x1], 0  ;;  %s1423_s21 = smov 0   ;;  %s1425_s22 = smov 0  }
   0x2   :  { %s1427_s23 = smov 0   ;;  %s1429_s24 = smov 0  }
   0x3 LB: > { %s1444_s25 = sadd.s32 4294967295, %s1383_s24   ;;  %s1039_s26 = sadd.s32 4294967294, %s1383_s24   ;;  %s1383_s24 = sphi %s1429_s24, %s1662_s24   ;;  %s1379_s23 = sphi %s1427_s23, %s1661_s23   ;;  %s1375_s22 = sphi %s1425_s22, %s1660_s22   ;;  %s1371_s21 = sphi %s1423_s21, %s1659_s21  }
   0x4   : > { %s1448_s27 = sadd.s32 1, %s1383_s24   ;;  %s162_s28 = sadd.s32 1, %s1379_s23 }
   0x5   : > { %s159_s29 = ssub.s32 %s1383_s24, %s1448_s27  ;;  %p172_p0 = scmp.ne.s32.totalorder %s1379_s23, %s1375_s22 }
   0x6   : > { %p160_p1 = scmp.eq.s32.totalorder %s159_s29, 0  ;;  %p173_p2 = scmp.eq.s32.totalorder %s1444_s25, 1 }
   0x7   : > { %p178_p3 = scmp.ne.s32.totalorder %s1375_s22, %s1371_s21  ;;  %p179_p4 = scmp.eq.s32.totalorder %s1039_s26, 1 }
   0x8   : > { %s1459_s30 = scalar_select %p160_p1, %s1379_s23, %s162_s28  }
   0x9   : > { %p1461_p5 = por %p173_p2, %p172_p0  ;;  %p1465_p6 = por %p179_p4, %p178_p3 }
   0xa   : > { %p1042_p7 = scmp.ge.s32.totalorder %s1383_s24, 1  ;;  %p227_p8 = scmp.lt.s32.totalorder %s1383_s24, 3 }
   0xc   : > { %p228_p9 = pnand %p1042_p7, %p227_p8 }
   0xd   : > { %v288_v0 = vld [vmem:[%s1652_s2] sm:$0xff] (!%p228_p9)  ;;  %v289_v1 = vld [vmem:[%s1652_s2 + $0x8] sm:$0xff] (!%p228_p9)  ;;  %s1044_s13 = sshll.u32 (!%p228_p9), %s1444_s25, 2  ;;  %v398_v2 = vld [vmem:[%s1652_s2 + $0x10] sm:$0xff] (!%p228_p9)  ;;  %vm296_vm0 = vcmask (!%p228_p9), 130048   ;;  %vm511_vm1 = vcmask (!%p228_p9), 64512  }
   0xe   : > { %231 = sbr.rel (%p228_p9) target bundleno = 1130 (0x46a), region = 44  ;;  %v1224_v3 = vpack.c.bf16 (!%p228_p9), %v289_v1, %v288_v0  ;;  %p263_p10 = scmp.lt.s32.totalorder (!%p228_p9), %s1044_s13, 7  ;;  %v399_v4 = vld [vmem:[%s1652_s2 + $0x18] sm:$0xff] (!%p228_p9)  ;;  %v400_v10 = vld [vmem:[%s1652_s2 + $0x20] sm:$0xff] (!%p228_p9)  ;;  %v401_v11 = vld [vmem:[%s1652_s2 + $0x28] sm:$0xff] (!%p228_p9)  ;;  %vm408_vm2 = vcmask (!%p228_p9), 261120  }
   0xf   : > { %v1228_v5 = vpack.c.bf16 (!%p228_p9), %v399_v4, %v398_v2  ;;  %v1232_v12 = vpack.c.bf16 (!%p228_p9), %v401_v11, %v400_v10  ;;  %v510_v13 = vld [vmem:[%s1653_s3 + $0x20] sm:$0xff] (!%p228_p9)  ;;  %v507_v15 = vld [vmem:[%s1653_s3 + $0x8] sm:$0xff] (!%p228_p9)  ;;  %v508_v32 = vld [vmem:[%s1653_s3 + $0x10] sm:$0xff] (!%p228_p9)  ;;  %vm734_vm3 = vcmask (!%p228_p9), 523264   ;;  %s1082_s10 = sshll.u32 (!%p228_p9), %s1444_s25, 9  ;;  %s1385_s16 = smov (!%p228_p9), [#allocation2]  }
  0x10   : > { %1225 = vmatprep.subr.bf16.mxu1 (!%p228_p9), %v1224_v3  ;;  %v506_v14 = vld [vmem:[%s1653_s3] sm:$0xff] (!%p228_p9)  ;;  %1158 = vmatprep.subr.mxu0 (!%p228_p9), %v510_v13  ;;  %v509_v33 = vld [vmem:[%s1653_s3 + $0x18] sm:$0xff] (!%p228_p9)  ;;  %v720_v37 = vld [vmem:[%s1653_s3 + $0x28] sm:$0xff] (!%p228_p9)  ;;  %s1325_s17 = sshll.u32 (!%p228_p9), %s1385_s16, 4  ;;  %s1326_s17 = int_to_ptr.vmem [resolvable:$false] %s1325_s17 }
  0x11   : > { %1227 = vmatpush3.bf16.msra.mxu1 (!%p228_p9), %v1224_v3  ;;  %v1236_v17 = vpack.c.bf16 (!%p228_p9), %v507_v15, %v506_v14  ;;  %1159 = vmatpush3.msra.mxu0 (!%p228_p9), %v510_v13  ;;  %v1048_v19 = vld [vmem:[%s1655_s5] ss:$0 sm:$0xff] (!%p228_p9)  ;;  %v1240_v35 = vpack.c.bf16 (!%p228_p9), %v509_v33, %v508_v32  ;;  %v721_v38 = vld [vmem:[%s1653_s3 + $0x30] sm:$0xff] (!%p228_p9)  ;;  %v722_v39 = vld [vmem:[%s1653_s3 + $0x38] sm:$0xff] (!%p228_p9)  ;;  %s1327_s19 = scalar_lea.vmem (!%p228_p9), %s1326_s17, 1024 }
  0x12   : > { %1229 = vmatprep.subr.bf16.mxu1 (!%p228_p9), %v1228_v5  ;;  %v1244_v40 = vpack.c.bf16 (!%p228_p9), %v721_v38, %v720_v37  ;;  %v723_v41 = vld [vmem:[%s1653_s3 + $0x40] sm:$0xff] (!%p228_p9)  ;;  %v724_v43 = vld [vmem:[%s1653_s3 + $0x48] sm:$0xff] (!%p228_p9)  ;;  %v725_v44 = vld [vmem:[%s1653_s3 + $0x50] sm:$0xff] (!%p228_p9) }
  0x13   : > { %1237 = vmatprep.subr.bf16.mxu0 (!%p228_p9), %v1236_v17  ;;  %v1248_v42 = vpack.c.bf16 (!%p228_p9), %v723_v41, %v722_v39  ;;  %v1252_v45 = vpack.c.bf16 (!%p228_p9), %v725_v44, %v724_v43  ;;  %v1053_v46 = vld [vmem:[%s1655_s5 + $0x1] ss:$0 sm:$0xff] (!%p228_p9)  ;;  %v726_v55 = vld [vmem:[%s1653_s3 + $0x58] sm:$0xff] (!%p228_p9)  ;;  %v837_v59 = vld [vmem:[%s1654_s4 + $0x8] sm:$0xff] (!%p228_p9) }
  0x14   : > { %v727_v56 = vld [vmem:[%s1653_s3 + $0x60] sm:$0xff] (!%p228_p9)  ;;  %v838_v60 = vld [vmem:[%s1654_s4 + $0x10] sm:$0xff] (!%p228_p9)  ;;  %v839_v62 = vld [vmem:[%s1654_s4 + $0x18] sm:$0xff] (!%p228_p9) }
  0x15   : > { %s1664_s13 = smov (!%p263_p10, %s1044_s13), 7  ;;  %v1256_v57 = vpack.c.bf16 %v727_v56, %v726_v55  ;;  %v836_v58 = vld [vmem:[%s1654_s4] sm:$0xff]  ;;  %v1264_v63 = vpack.c.bf16 %v839_v62, %v838_v60  ;;  %v841_v1 = vld [vmem:[%s1654_s4 + $0x28] sm:$0xff] }
  0x16   : > { %s1045_s18 = sshll.u32 %s1664_s13, 3  ;;  %v1260_v61 = vpack.c.bf16 %v837_v59, %v836_v58  ;;  %v840_v0 = vld [vmem:[%s1654_s4 + $0x20] sm:$0xff]  ;;  %s1607_s13 = scalar_lea.hbm %s1656_s6, %s1082_s10 }
  0x17   : > { %s266_s26 = scalar_lea.vmem %s1650_s0, %s1045_s18  ;;  %s1499_s15 = scalar_lea.vmem %s1651_s1, %s1045_s18  ;;  %v1268_v2 = vpack.c.bf16 %v841_v1, %v840_v0  ;;  %v1066_v3 = vld [vmem:[%s1655_s5 + $0x2] ss:$0 sm:$0xff]  ;;  %v1072_v32 = vld [vmem:[%s1655_s5 + $0x4] ss:$0 sm:$0xff] }
  0x18   : > { %v275_v6 = vld [vmem:[%s266_s26] sm:$0xff]  ;;  %v276_v7 = vld [vmem:[%s266_s26 + $0x8] sm:$0xff]  ;;  %v277_v8 = vld [vmem:[%s266_s26 + $0x10] sm:$0xff] }
  0x19   : > { %1138 = vmatprep.mubr.msk.f32.mxu1 %vm296_vm0, %v275_v6  ;;  %v278_v9 = vld [vmem:[%s266_s26 + $0x18] sm:$0xff]  ;;  %v279_v16 = vld [vmem:[%s1499_s15] sm:$0xff]  ;;  %v280_v18 = vld [vmem:[%s1499_s15 + $0x8] sm:$0xff] }
  0x1a   : > { %1139 = vmatmul.mubr.msk.f32.vlgmr.msra.gmra.mrb[0].mxu1 %vm296_vm0, %v276_v7  ;;  %1160 = vmatprep.mubr.msk.f32.mxu0 %vm511_vm1, %v279_v16  ;;  %v281_v34 = vld [vmem:[%s1499_s15 + $0x10] sm:$0xff]  ;;  %v282_v36 = vld [vmem:[%s1499_s15 + $0x18] sm:$0xff]  ;;  %s259_s15 = sand.u32 1, %s1375_s22  }
  0x1b   : > { %1141 = vmatprep.mubr.msk.f32.mxu1 %vm296_vm0, %v277_v8  ;;  %1231 = vmatpush3.bf16.msra.mxu1 %v1228_v5  ;;  %v842_v16 = vld [vmem:[%s1654_s4 + $0x30] sm:$0xff]  ;;  %s1043_s18 = sshll.u32 %s259_s15, 5  ;;  %s1609_s14 = scalar_lea.sflag [#allocation3], %s259_s15 }
  0x1c   : > { %1233 = vmatprep.subr.bf16.mxu1 %v1232_v12  ;;  %1161 = vmatmul.mubr.msk.f32.vlgmr.msra.gmra.mrb[0].mxu0 %vm511_vm1, %v280_v18  ;;  %s261_s29 = scalar_lea.vmem [#allocation2], %s1043_s18 }
  0x1d   : > { %1239 = vmatpush3.bf16.msra.mxu0 %v1236_v17  ;;  %1163 = vmatprep.mubr.msk.f32.mxu0 %vm511_vm1, %v281_v34  ;;  %v843_v17 = vld [vmem:[%s1654_s4 + $0x38] sm:$0xff]  ;;  %s965_s9 = sshll.u32 %s261_s29, 4  ;;  %s1602_s9 = int_to_ptr.vmem [resolvable:$true] %s965_s9 }
  0x1e   : > { %1142 = vmatmul.mubr.msk.f32.gmra.mrb[2].mxu1 %vm296_vm0, %v278_v9  ;;  %1241 = vmatprep.subr.bf16.mxu0 %v1240_v35  ;;  %v1272_v18 = vpack.c.bf16 %v843_v17, %v842_v16  ;;  %s1321_s25 = scalar_lea.vmem %s1602_s9, 512  ;;  %p1328_p0 = scmp.lt.s32.totalorder %s1602_s9, %s1326_s17 }
  0x1f   : > { %1235 = vmatpush3.bf16.msra.mxu1 %v1232_v12  ;;  %p1322_p11 = scmp.ne.s32.totalorder %s1602_s9, %s1321_s25  ;;  %p1329_p1 = scmp.lt.s32.totalorder %s1327_s19, %s1321_s25 }
  0x20   : > { %1164 = vmatmul.mubr.msk.f32.gmra.mrb[2].mxu0 %vm511_vm1, %v282_v36  ;;  %1245 = vmatprep.subr.bf16.mxu1 %v1244_v40 }
  0x21   : > { %1243 = vmatpush3.bf16.msra.mxu0 %v1240_v35  ;;  %p1323_p12 = pnand %p1322_p11, %p1461_p5  ;;  %p1330_p2 = por %p1329_p1, %p1328_p0 }
  0x22   : > { %1261 = vmatprep.subr.bf16.mxu0 %v1260_v61 }
  0x23   : > { %p1324_p13 = pneg %p1323_p12 }
  0x25   : > { %p1331_p3 = pnand %p1330_p2, %p1324_p13 }
  0xed   : > { %v1140_v20 = vpop.f32.mrb[0].mxu1 }
  0xee   : > { %v381_v21 = vadd.f32 %v1140_v20, %v1048_v19  ;;  %v375_v22 = vpop.f32.mrb[1].mxu1 }
  0xef   : > { %v376_v23 = vadd.f32 %v1048_v19, %v375_v22 }
  0xf0   : > { %v395_v26 = vmax.f32 %v381_v21, 0.0 }
  0xf1   : > { %v394_v24 = vmax.f32 %v376_v23, 0.0  ;;  %v1143_v25 = vpop.f32.mrb[2].mxu1 }
  0xf2   : > { %v391_v27 = vadd.f32 %v1143_v25, %v1048_v19  ;;  %v385_v28 = vpop.f32.mrb[3].mxu1 }
  0xf3   : > { %v386_v29 = vadd.f32 %v1048_v19, %v385_v28  ;;  %1152 = vmatprep.mubr.msk.f32.mxu1 %vm408_vm2, %v394_v24  ;;  %v1067_v19 = vld [vmem:[%s1655_s5 + $0x3] ss:$0 sm:$0xff] }
  0xf4   : > { %1153 = vmatmul.mubr.msk.f32.vlgmr.msra.gmra.mrb[4].mxu1 %vm408_vm2, %v395_v26  ;;  %v397_v31 = vmax.f32 %v391_v27, 0.0 }
  0xf5   : > { %v396_v30 = vmax.f32 %v386_v29, 0.0  ;;  %1247 = vmatpush3.bf16.msra.mxu1 %v1244_v40 }
  0xf6   : > { %1249 = vmatprep.subr.bf16.mxu1 %v1248_v42 }
  0xf7   : > { %1155 = vmatprep.mubr.msk.f32.mxu1 %vm408_vm2, %v396_v30 }
  0xf8   : > { %1156 = vmatmul.mubr.msk.f32.gmra.mrb[6].mxu1 %vm408_vm2, %v397_v31 }
  0xf9   : > { %1251 = vmatpush3.bf16.msra.mxu1 %v1248_v42 }
  0xfa   : > { %1253 = vmatprep.subr.bf16.mxu1 %v1252_v45 }
  0xfd   : > { %1255 = vmatpush3.bf16.msra.mxu1 %v1252_v45 }
  0xfe   : > { %1257 = vmatprep.subr.bf16.mxu1 %v1256_v57 }
 0x101   : > { %1259 = vmatpush3.bf16.msra.mxu1 %v1256_v57 }
 0x1c7   : > { %v1154_v47 = vpop.f32.mrb[4].mxu1 }
 0x1c8   : > { %v487_v48 = vpop.f32.mrb[5].mxu1  ;;  %v493_v50 = vadd.f32 %v1154_v47, %v1053_v46 }
 0x1c9   : > { %v488_v49 = vadd.f32 %v1053_v46, %v487_v48 }
 0x1cb   : > { %v1157_v51 = vpop.f32.mrb[6].mxu1  ;;  %1174 = vmatprep.mubr.msk.f32.mxu0 %vm408_vm2, %v488_v49 }
 0x1cc   : > { %v497_v52 = vpop.f32.mrb[7].mxu1  ;;  %1175 = vmatmul.mubr.msk.f32.vlgmr.msra.gmra.mrb[0].mxu0 %vm408_vm2, %v493_v50  ;;  %v503_v54 = vadd.f32 %v1157_v51, %v1053_v46 }
 0x1cd   : > { %v498_v53 = vadd.f32 %v1053_v46, %v497_v52  ;;  %1263 = vmatpush3.bf16.msra.mxu0 %v1260_v61 }
 0x1ce   : > { %1265 = vmatprep.subr.bf16.mxu0 %v1264_v63 }
 0x1cf   : > { %1177 = vmatprep.mubr.msk.f32.mxu0 %vm408_vm2, %v498_v53 }
 0x1d0   : > { %1178 = vmatmul.mubr.msk.f32.gmra.mrb[2].mxu0 %vm408_vm2, %v503_v54 }
 0x1d1   : > { %1267 = vmatpush3.bf16.msra.mxu0 %v1264_v63 }
 0x1d2   : > { %1269 = vmatprep.subr.bf16.mxu0 %v1268_v2 }
 0x1d5   : > { %1271 = vmatpush3.bf16.msra.mxu0 %v1268_v2 }
 0x1d6   : > { %1273 = vmatprep.subr.bf16.mxu0 %v1272_v18 }
 0x1d9   : > { %1275 = vmatpush3.bf16.msra.mxu0 %v1272_v18 }
 0x29f   : > { %v1176_v4 = vpop.f32.mrb[0].mxu0 }
 0x2a0   : > { %v713_v5 = vadd.f32 %v1176_v4, %v1066_v3  ;;  %v687_v6 = vpop.f32.mrb[1].mxu0 }
 0x2a1   : > { %v712_v7 = vadd.f32 %v1066_v3, %v687_v6 }
 0x2a2   : > { %v717_v10 = vmax.f32 %v713_v5, 0.0 }
 0x2a3   : > { %v716_v8 = vmax.f32 %v712_v7, 0.0  ;;  %v1179_v9 = vpop.f32.mrb[2].mxu0 }
 0x2a4   : > { %v715_v11 = vadd.f32 %v1179_v9, %v1066_v3  ;;  %v697_v12 = vpop.f32.mrb[3].mxu0 }
 0x2a5   : > { %v714_v13 = vadd.f32 %v1066_v3, %v697_v12  ;;  %1196 = vmatprep.mubr.msk.f32.mxu1 %vm734_vm3, %v716_v8 }
 0x2a6   : > { %1197 = vmatmul.mubr.msk.f32.vlgmr.msra.gmra.mrb[8].mxu1 %vm734_vm3, %v717_v10  ;;  %v719_v15 = vmax.f32 %v715_v11, 0.0 }
 0x2a7   : > { %v718_v14 = vmax.f32 %v714_v13, 0.0 }
 0x2a9   : > { %1199 = vmatprep.mubr.msk.f32.mxu1 %vm734_vm3, %v718_v14 }
 0x2aa   : > { %1200 = vmatmul.mubr.msk.f32.gmra.mrb[10].mxu1 %vm734_vm3, %v719_v15 }
 0x379   : > { %v1198_v20 = vpop.f32.mrb[8].mxu1 }
 0x37a   : > { %v819_v21 = vadd.f32 %v1198_v20, %v1067_v19  ;;  %v813_v22 = vpop.f32.mrb[9].mxu1 }
 0x37b   : > { %v814_v23 = vadd.f32 %v1067_v19, %v813_v22 }
 0x37c   : > { %v833_v26 = vmax.f32 %v819_v21, 0.0 }
 0x37d   : > { %v832_v24 = vmax.f32 %v814_v23, 0.0  ;;  %v1201_v25 = vpop.f32.mrb[10].mxu1 }
 0x37e   : > { %v829_v27 = vadd.f32 %v1201_v25, %v1067_v19  ;;  %v823_v28 = vpop.f32.mrb[11].mxu1 }
 0x37f   : > { %v824_v29 = vadd.f32 %v1067_v19, %v823_v28  ;;  %1218 = vmatprep.mubr.msk.f32.mxu0 %vm734_vm3, %v832_v24 }
 0x380   : > { %1219 = vmatmul.mubr.msk.f32.vlgmr.msra.gmra.mrb[4].mxu0 %vm734_vm3, %v833_v26  ;;  %v835_v31 = vmax.f32 %v829_v27, 0.0 }
 0x381   : > { %v834_v30 = vmax.f32 %v824_v29, 0.0 }
 0x383   : > { %1221 = vmatprep.mubr.msk.f32.mxu0 %vm734_vm3, %v834_v30 }
 0x384   : > { %1222 = vmatmul.mubr.msk.f32.gmra.mrb[6].mxu0 %vm734_vm3, %v835_v31 }
 0x453   : > { %v1220_v33 = vpop.f32.mrb[4].mxu0 }
 0x454   : > { %v934_v34 = vadd.f32 %v1220_v33, %v1072_v32  ;;  %v928_v35 = vpop.f32.mrb[5].mxu0 }
 0x455   : > { %v929_v36 = vadd.f32 %v1072_v32, %v928_v35 }
 0x456   : > { %948 = vst [vmem:[%s261_s29 + $0x8] sm:$0xff] %v934_v34 }
 0x457   : > { %947 = vst [vmem:[%s261_s29] sm:$0xff] %v929_v36  ;;  %v1223_v37 = vpop.f32.mrb[6].mxu0 }
 0x458   : > { %v944_v38 = vadd.f32 %v1223_v37, %v1072_v32  ;;  %v938_v39 = vpop.f32.mrb[7].mxu0 }
 0x459   : > { %v939_v40 = vadd.f32 %v1072_v32, %v938_v39 }
 0x45a   : > { %950 = vst [vmem:[%s261_s29 + $0x18] sm:$0xff] %v944_v38 }
 0x45b   : > { %949 = vst [vmem:[%s261_s29 + $0x10] sm:$0xff] %v939_v40 }
 0x45c   : > { %1334 = shalt.err (!%p1331_p3)
}
 0x45d   : > { %s1335_s20 = scalar_lea.hbm %s1607_s13, 512  ;;  %s1339_s26 = scalar_lea.hbm %s1656_s6, 1024 }
 0x45e   : > { %p1336_p4 = scmp.ne.s32.totalorder %s1607_s13, %s1335_s20  ;;  %p1340_p9 = scmp.lt.u32.totalorder %s1607_s13, %s1656_s6 }
 0x45f   : > { %p1341_p10 = scmp.lt.u32.totalorder %s1339_s26, %s1335_s20  ;;  %p1343_p12 = scmp.lt.u32.totalorder %s1335_s20, %s1607_s13 }
 0x460   : > { %p1337_p7 = pnand %p1336_p4, %p1461_p5 }
 0x461   : > { %p1342_p11 = por %p1341_p10, %p1340_p9 }
 0x462   : > { %p1338_p8 = pneg %p1337_p7 }
 0x463   : > { %p1344_p13 = por %p1343_p12, %p1342_p11 }
 0x465   : > { %p1345_p0 = pnand %p1344_p13, %p1338_p8 }
 0x467   : > { %1348 = shalt.err (!%p1345_p0)
}
 0x468   : > { %s1386_s10 = smov 128   ;;  %s1387_s11 = smov 8  }
 0x469   : > { %1280 = dma.vmem_to_hbm [thread:$0]  (%p1461_p5), %s1602_s9, 512, %s1607_s13, %s1609_s14, %s1386_s10, %s1386_s10, %s1387_s11  }
 0x46a PF: > { %p1286_p1 = scmp.ge.s32.totalorder %s1383_s24, 2  ;;  %s980_s12 = sand.u32 1, %s1371_s21  }
 0x46b   : > { %s981_s25 = scalar_lea.sflag [#allocation3], %s980_s12 }
 0x46c   : > { %p1283_p2 = pnand %p1286_p1, %p1465_p6 }
 0x46e   : > { %1366 = dma.done.wait (!%p1283_p2), %s981_s25, 512  }
 0x46f   : > { %1368 = vsyncadd (!%p1283_p2), %s981_s25, 4294966784  ;;  %p16_p3 = scmp.ge.s32.totalorder %s1448_s27, 4   ;;  %s1659_s21 = smov %s1375_s22 }
 0x470   : > { %s1660_s22 = smov %s1379_s23  ;;  %s1661_s23 = smov %s1459_s30 }
 0x471   : > { %s1662_s24 = smov %s1448_s27  ;;  %18 = sbr.rel (!%p16_p3) target bundleno = 3 (0x3), region = 82 }
 0x478   :  { %986 = vsyncpa [#allocation3], 1 }
 0x479   :  { %988 = vsyncpa [#allocation3 + $0x1], 1 }

</bundles_post_ra>
